<compile_context>
chip_gen: v6e
topology: v6e:2x2x1
jax: 0.10.0
libtpu: 0.0.40
codegen_flags: <defaults>
</compile_context>

<pallas_src>
import functools

import jax
import jax.numpy as jnp
from jax import lax
from jax.experimental import pallas as pl
from jax.experimental.pallas import tpu as pltpu


# ----------------------------------------------------------------------------
# VMEM limit: per-generation, derived from hardware (review: don't hardcode).
# ----------------------------------------------------------------------------
@functools.lru_cache(maxsize=None)
def _default_vmem_limit_bytes():
    try:
        cap = getattr(pltpu.get_tpu_info(), "vmem_capacity_bytes", None)
        if cap is None:
            return None
        # Leave ~16 MiB headroom; cap at ~100 MiB.
        # v5e/v6e (128 MiB physical) -> 100 MiB;  v7x (64 MiB) -> 48 MiB.
        return int(max(32 << 20, min(int(cap) - (16 << 20), 100 << 20)))
    except Exception:
        return None


# ----------------------------------------------------------------------------
# Kernel 1: row-tiled input projection  (TM, E) @ (E, 4H) + bias.
# Weight/bias blocks use constant index maps (VMEM-resident); row axis is
# "parallel" so v7x's second TensorCore gets half the rows.
# ----------------------------------------------------------------------------
def _input_proj_kernel(x_ref, w_ref, b_ref, o_ref):
    o_ref[...] = (
        jnp.dot(x_ref[...], w_ref[...], preferred_element_type=jnp.float32)
        + b_ref[...]
    ).astype(o_ref.dtype)


def input_projection_pallas(x2d, w_t, bias, out_dtype=jnp.float32, tm=None):
    """x2d: (M, E), w_t: (E, 4H), bias: (1, 4H) f32 -> (M, 4H) out_dtype."""
    M, E = x2d.shape
    G = w_t.shape[1]
    if tm is None:
        tm = 1024 if x2d.dtype == jnp.bfloat16 else 512
    tm = min(tm, M)
    grid_m = pl.cdiv(M, tm)
    return pl.pallas_call(
        _input_proj_kernel,
        out_shape=jax.ShapeDtypeStruct((M, G), out_dtype),
        grid_spec=pltpu.PrefetchScalarGridSpec(
            num_scalar_prefetch=0,
            grid=(grid_m,),
            in_specs=[
                pl.BlockSpec((tm, E), lambda i: (i, 0)),
                pl.BlockSpec((E, G), lambda i: (0, 0)),   # weight stays put
                pl.BlockSpec((1, G), lambda i: (0, 0)),
            ],
            out_specs=pl.BlockSpec((tm, G), lambda i: (i, 0)),
        ),
        compiler_params=pltpu.CompilerParams(
            dimension_semantics=("parallel",),
            vmem_limit_bytes=_default_vmem_limit_bytes()),
    )(x2d, w_t, bias.astype(jnp.float32))


# ----------------------------------------------------------------------------
# Kernel 2: fused multi-layer LSTM recurrence.
# grid = (B // b_block, S // t_chunk): batch "parallel", time "arbitrary".
# h/c state for all layers lives in VMEM scratch, persists across time chunks.
# ----------------------------------------------------------------------------
def _fused_lstm_kernel(*refs, n_layers, hidden_dim, t_chunk, unroll):
    if n_layers > 1:
        (pg_ref, w_hh0_ref, w_ih_rest_ref, w_hh_rest_ref, b_rest_ref,
         h_out_ref, c_out_ref, h_scr, c_scr) = refs
    else:
        (pg_ref, w_hh0_ref, h_out_ref, c_out_ref, h_scr, c_scr) = refs

    H = hidden_dim
    t_idx = pl.program_id(1)
    mm_dtype = w_hh0_ref.dtype  # matmul operand dtype (f32 or bf16)

    @pl.when(t_idx == 0)
    def _():
        h_scr[...] = jnp.zeros_like(h_scr)
        c_scr[...] = jnp.zeros_like(c_scr)

    def gate_math(gates, c):
        # PyTorch gate order: i, f, g, o.  Gate math stays f32 (v5e has no
        # bf16 VPU/EUP).  NOTE: at production sizes make H a multiple of 128
        # so the gate slices fall on lane-tile boundaries and the h/c stores
        # are lane-dense (unmasked vst).
        i_g = jax.nn.sigmoid(gates[:, 0 * H:1 * H])
        f_g = jax.nn.sigmoid(gates[:, 1 * H:2 * H])
        g_g = jnp.tanh(gates[:, 2 * H:3 * H])
        o_g = jax.nn.sigmoid(gates[:, 3 * H:4 * H])
        c_new = f_g * c + i_g * g_g
        h_new = o_g * jnp.tanh(c_new)
        return h_new, c_new

    def step(i, carry):
        # --- layer 0: x-projection precomputed -> only the recurrent matmul.
        # pg_ref[i]: dynamic index on the (untiled) leading time axis — robust
        # and composes with the batch-parallel grid axis.
        # TODO(synk): at tiny B a flattened (S*B, 4H) pregate layout would be
        # sublane-dense; kept 3-D here for the leading-dim index + batch grid.
        h0 = h_scr[0]
        c0 = c_scr[0]
        gates0 = pg_ref[i].astype(jnp.float32) + jnp.dot(
            h0.astype(mm_dtype), w_hh0_ref[...],
            preferred_element_type=jnp.float32)
        h_new, c_new = gate_math(gates0, c0)
        h_scr[0] = h_new
        c_scr[0] = c_new
        x = h_new
        # --- layers >= 1: two MXU dots (no per-step lane concat).
        # (inter-layer nn.LSTM dropout is identity in eval mode)
        for l in range(1, n_layers):
            h = h_scr[l]
            c = c_scr[l]
            gates = (jnp.dot(x.astype(mm_dtype), w_ih_rest_ref[l - 1],
                             preferred_element_type=jnp.float32)
                     + jnp.dot(h.astype(mm_dtype), w_hh_rest_ref[l - 1],
                               preferred_element_type=jnp.float32)
                     + b_rest_ref[l - 1])
            h_new, c_new = gate_math(gates, c)
            h_scr[l] = h_new
            c_scr[l] = c_new
            x = h_new
        return carry

    # Partial unroll: LLO scheduler visibility without blowing vregs when the
    # time chunk is large.
    lax.fori_loop(0, t_chunk, step, 0, unroll=unroll)

    # Only the last time chunk writes the (VMEM-resident) output block; its
    # HBM writeback then carries exactly (h_T, c_T) for this batch block.
    @pl.when(t_idx == pl.num_programs(1) - 1)
    def _():
        h_out_ref[...] = h_scr[...].astype(h_out_ref.dtype)
        c_out_ref[...] = c_scr[...].astype(c_out_ref.dtype)


def _pick_time_chunk(s, max_chunk=32):
    # Largest divisor of s that is <= max_chunk (always exists; worst case 1).
    # TODO(synk): for prime/awkward S, pad the time axis instead of chunk=1.
    for c in range(min(s, max_chunk), 0, -1):
        if s % c == 0:
            return c
    return 1


def fused_lstm_pallas(pregates0, w_hh0_t, w_ih_rest, w_hh_rest, b_rest,
                      n_layers, hidden_dim, *, t_chunk=None, b_block=None,
                      vmem_limit_bytes=None):
    """pregates0: (S, B, 4H) (layer-0 x-projection with folded biases).
    w_hh0_t: (H, 4H).  w_ih_rest/w_hh_rest: (L-1, H, 4H) or None.
    b_rest: (L-1, 1, 4H) f32 or None.
    Returns (h_T, c_T), each (n_layers, B, H) float32."""
    S, B, G = pregates0.shape
    H = hidden_dim
    L = n_layers

    if t_chunk is None or S % t_chunk != 0:
        t_chunk = _pick_time_chunk(S, max_chunk=(t_chunk or 32))
    n_chunks = S // t_chunk
    if b_block is None or B % b_block != 0:
        b_block = B
    n_bblocks = B // b_block
    unroll = max(1, min(t_chunk, 8))

    if vmem_limit_bytes is None:
        vmem_limit_bytes = _default_vmem_limit_bytes()

    kernel = functools.partial(_fused_lstm_kernel, n_layers=L, hidden_dim=H,
                               t_chunk=t_chunk, unroll=unroll)

    # Constant-index weight blocks stay VMEM-resident across the whole grid.
    # TODO(synk): pipeline_mode=pl.Buffered(1) on these specs would halve the
    # resident weight footprint on v7x (64 MiB VMEM); left at the default
    # buffering pending support in the deployed Pallas version.
    in_specs = [
        pl.BlockSpec((t_chunk, b_block, G), lambda b, t: (t, b, 0)),
        pl.BlockSpec((H, G), lambda b, t: (0, 0)),
    ]
    inputs = [pregates0, w_hh0_t]
    if L > 1:
        LW = L - 1
        in_specs += [
            pl.BlockSpec((LW, H, G), lambda b, t: (0, 0, 0)),
            pl.BlockSpec((LW, H, G), lambda b, t: (0, 0, 0)),
            pl.BlockSpec((LW, 1, G), lambda b, t: (0, 0, 0)),
        ]
        inputs += [w_ih_rest, w_hh_rest, b_rest]
    # (L == 1: no dummy weights are fed at all — no wasted DMA / VMEM.)

    h_out, c_out = pl.pallas_call(
        kernel,
        out_shape=(
            jax.ShapeDtypeStruct((L, B, H), jnp.float32),
            jax.ShapeDtypeStruct((L, B, H), jnp.float32),
        ),
        grid_spec=pltpu.PrefetchScalarGridSpec(
            num_scalar_prefetch=0,
            grid=(n_bblocks, n_chunks),
            in_specs=in_specs,
            out_specs=[
                pl.BlockSpec((L, b_block, H), lambda b, t: (0, b, 0)),
                pl.BlockSpec((L, b_block, H), lambda b, t: (0, b, 0)),
            ],
            scratch_shapes=[
                pltpu.VMEM((L, b_block, H), jnp.float32),
                pltpu.VMEM((L, b_block, H), jnp.float32),
            ],
        ),
        compiler_params=pltpu.CompilerParams(
            dimension_semantics=("parallel", "arbitrary"),
            vmem_limit_bytes=vmem_limit_bytes),
    )(*inputs)
    return h_out, c_out


# ----------------------------------------------------------------------------
# Encoder: embedding gather (glue) + dropout(eval) + Pallas kernels.
# ----------------------------------------------------------------------------
def init_encoder_params(key, input_dim, embedding_dim, hidden_dim, n_layers):
    keys = jax.random.split(key, 1 + 4 * n_layers)
    params = {"embedding": jax.random.normal(
        keys[0], (input_dim, embedding_dim), jnp.float32) * 0.1}
    layers = []
    for l in range(n_layers):
        in_dim = embedding_dim if l == 0 else hidden_dim
        k = keys[1 + 4 * l:1 + 4 * (l + 1)]
        scale = 1.0 / jnp.sqrt(hidden_dim)
        layers.append({
            "w_ih": jax.random.uniform(k[0], (4 * hidden_dim, in_dim),
                                       jnp.float32, -scale, scale),
            "w_hh": jax.random.uniform(k[1], (4 * hidden_dim, hidden_dim),
                                       jnp.float32, -scale, scale),
            "b_ih": jax.random.uniform(k[2], (4 * hidden_dim,),
                                       jnp.float32, -scale, scale),
            "b_hh": jax.random.uniform(k[3], (4 * hidden_dim,),
                                       jnp.float32, -scale, scale),
        })
    params["layers"] = layers
    return params


def encoder_forward(params, src, *, t_chunk=None, b_block=None,
                    compute_dtype=jnp.float32, use_input_table=None):
    """src: (S, B) int32.  Returns (hidden, cell), each (n_layers, B, H) f32.

    compute_dtype: matmul operand dtype (f32 or bf16); accumulation, gate math
    and cell state always stay f32.
    b_block: batch rows per grid block (set B//2 on v7x to use both TCs).
    """
    S, B = src.shape
    emb = params["embedding"]
    V, E = emb.shape
    layers = params["layers"]
    L = len(layers)
    H = layers[0]["w_hh"].shape[1]
    G = 4 * H
    cd = compute_dtype

    # Dropout on the embedding is identity in eval mode.
    w_ih0_t = jnp.transpose(layers[0]["w_ih"]).astype(cd)            # (E, 4H)
    b0 = (layers[0]["b_ih"] + layers[0]["b_hh"]).reshape(1, G).astype(
        jnp.float32)

    if use_input_table is None:
        use_input_table = V <= S * B
    if use_input_table:
        # (emb[src]) @ W^T + b  ==  (emb @ W^T + b)[src]: one tiny Pallas
        # matmul over the vocab, then a pure gather (glue).
        table = input_projection_pallas(emb.astype(cd), w_ih0_t, b0,
                                        out_dtype=cd)                # (V, 4H)
        pregates0 = table[src]                                       # (S,B,4H)
    else:
        embedded = emb[src].astype(cd)                               # (S,B,E)
        pregates0 = input_projection_pallas(
            embedded.reshape(S * B, E), w_ih0_t, b0,
            out_dtype=cd).reshape(S, B, G)

    w_hh0_t = jnp.transpose(layers[0]["w_hh"]).astype(cd)            # (H, 4H)
    if L > 1:
        w_ih_rest = jnp.stack(
            [jnp.transpose(layers[l]["w_ih"]) for l in range(1, L)]
        ).astype(cd)                                                 # (L-1,H,4H)
        w_hh_rest = jnp.stack(
            [jnp.transpose(layers[l]["w_hh"]) for l in range(1, L)]
        ).astype(cd)                                                 # (L-1,H,4H)
        b_rest = jnp.stack(
            [(layers[l]["b_ih"] + layers[l]["b_hh"]).reshape(1, G)
             for l in range(1, L)]).astype(jnp.float32)              # (L-1,1,4H)
    else:
        w_ih_rest = w_hh_rest = b_rest = None

    return fused_lstm_pallas(pregates0, w_hh0_t, w_ih_rest, w_hh_rest, b_rest,
                             n_layers=L, hidden_dim=H,
                             t_chunk=t_chunk, b_block=b_block)


# ----------------------------------------------------------------------------
# Pure-JAX reference (lax.scan) for correctness checking.
# ----------------------------------------------------------------------------
def _lstm_layer_ref(x, w_ih, w_hh, b_ih, b_hh):
    H = w_hh.shape[1]
    B = x.shape[1]

    def step(carry, x_t):
        h, c = carry
        gates = x_t @ w_ih.T + h @ w_hh.T + b_ih + b_hh
        i = jax.nn.sigmoid(gates[:, 0 * H:1 * H])
        f = jax.nn.sigmoid(gates[:, 1 * H:2 * H])
        g = jnp.tanh(gates[:, 2 * H:3 * H])
        o = jax.nn.sigmoid(gates[:, 3 * H:4 * H])
        c_new = f * c + i * g
        h_new = o * jnp.tanh(c_new)
        return (h_new, c_new), h_new

    init = (jnp.zeros((B, H), jnp.float32), jnp.zeros((B, H), jnp.float32))
    (h_T, c_T), outs = lax.scan(step, init, x)
    return outs, h_T, c_T


def encoder_forward_ref(params, src):
    x = params["embedding"][src]
    h_list, c_list = [], []
    for lp in params["layers"]:
        x, h_T, c_T = _lstm_layer_ref(x, lp["w_ih"], lp["w_hh"],
                                      lp["b_ih"], lp["b_hh"])
        h_list.append(h_T)
        c_list.append(c_T)
    return jnp.stack(h_list, axis=0), jnp.stack(c_list, axis=0)


if __name__ == "__main__":
    INPUT_DIM = 16       # vocab size
    EMBEDDING_DIM = 32
    HIDDEN_DIM = 32
    N_LAYERS = 2
    SEQ_LEN = 8
    BATCH = 4

    key = jax.random.PRNGKey(0)
    pkey, skey, skey2 = jax.random.split(key, 3)
    params = init_encoder_params(pkey, INPUT_DIM, EMBEDDING_DIM,
                                 HIDDEN_DIM, N_LAYERS)
    src = jax.random.randint(skey, (SEQ_LEN, BATCH), 0, INPUT_DIM,
                             dtype=jnp.int32)
    h_ref, c_ref = encoder_forward_ref(params, src)

    # 1) f32, auto input path (vocab-table gather), single batch block.
    hidden, cell = jax.block_until_ready(encoder_forward(params, src))
    assert hidden.shape == (N_LAYERS, BATCH, HIDDEN_DIM)
    assert cell.shape == (N_LAYERS, BATCH, HIDDEN_DIM)
    assert jnp.allclose(hidden, h_ref, atol=1e-4, rtol=1e-4)
    assert jnp.allclose(cell, c_ref, atol=1e-4, rtol=1e-4)

    # 2) f32, forced row-tiled projection path (exercises the (M,E)@(E,4H)
    #    kernel) + explicit time chunk.
    hidden2, cell2 = jax.block_until_ready(
        encoder_forward(params, src, use_input_table=False, t_chunk=4))
    assert jnp.allclose(hidden2, h_ref, atol=1e-4, rtol=1e-4)
    assert jnp.allclose(cell2, c_ref, atol=1e-4, rtol=1e-4)

    # 3) bf16 matmul operands (f32 accumulation + gate math) -> looser tol.
    hidden3, cell3 = jax.block_until_ready(
        encoder_forward(params, src, compute_dtype=jnp.bfloat16))
    assert jnp.allclose(hidden3, h_ref, atol=5e-2, rtol=5e-2)
    assert jnp.allclose(cell3, c_ref, atol=5e-2, rtol=5e-2)

    # 4) batch-blocked grid (the "parallel" batch axis used for v7x megacore).
    B2 = 16
    src2 = jax.random.randint(skey2, (SEQ_LEN, B2), 0, INPUT_DIM,
                              dtype=jnp.int32)
    h_ref2, c_ref2 = encoder_forward_ref(params, src2)
    hidden4, cell4 = jax.block_until_ready(
        encoder_forward(params, src2, b_block=8))
    assert jnp.allclose(hidden4, h_ref2, atol=1e-4, rtol=1e-4)
    assert jnp.allclose(cell4, c_ref2, atol=1e-4, rtol=1e-4)

    print("KERNEL_OK")
</pallas_src>

<mosaic_0001>
module attributes {stable_mosaic.version = 11 : i64} {
  func.func @_input_proj_kernel(%arg0: i32, %arg1: memref<16x32xf32, #tpu.memory_space<vmem>>, %arg2: memref<32x128xf32, #tpu.memory_space<vmem>>, %arg3: memref<1x128xf32, #tpu.memory_space<vmem>>, %arg4: memref<16x128xf32, #tpu.memory_space<vmem>>) attributes {dimension_semantics = [#tpu.dimension_semantics<parallel>], iteration_bounds = array<i64: 1>, scalar_prefetch = 0 : i64, scratch_operands = 0 : i64, tpu.core_type = #tpu.core_type<tc>, window_params = [{transform_indices = @transform_0, window_bounds = array<i64: 16, 32>}, {pipeline_mode = #tpu.pipeline_mode<synchronous>, transform_indices = @transform_1, window_bounds = array<i64: 32, 128>}, {pipeline_mode = #tpu.pipeline_mode<synchronous>, transform_indices = @transform_2, window_bounds = array<i64: 1, 128>}, {transform_indices = @transform_3, window_bounds = array<i64: 16, 128>}]} {
    %c0 = arith.constant 0 : index
    %c0_0 = arith.constant 0 : index
    %0 = vector.load %arg1[%c0, %c0_0] : memref<16x32xf32, #tpu.memory_space<vmem>>, vector<16x32xf32>
    %c0_1 = arith.constant 0 : index
    %c0_2 = arith.constant 0 : index
    %1 = vector.load %arg2[%c0_1, %c0_2] : memref<32x128xf32, #tpu.memory_space<vmem>>, vector<32x128xf32>
    %cst = arith.constant dense<0.000000e+00> : vector<16x128xf32>
    %2 = tpu.matmul %0, %1, %cst {dimension_numbers = #tpu.dot_dimension_numbers<[1], [0], [0], [1], [0, 0, 1, 1], [], []>} : vector<16x32xf32>, vector<32x128xf32>, vector<16x128xf32> -> vector<16x128xf32>
    %c0_3 = arith.constant 0 : index
    %c0_4 = arith.constant 0 : index
    %3 = vector.load %arg3[%c0_3, %c0_4] : memref<1x128xf32, #tpu.memory_space<vmem>>, vector<1x128xf32>
    %4 = vector.broadcast %3 : vector<1x128xf32> to vector<16x128xf32>
    %5 = arith.addf %2, %4 : vector<16x128xf32>
    %c0_5 = arith.constant 0 : index
    %c0_6 = arith.constant 0 : index
    %6 = vector.load %arg4[%c0_5, %c0_6] : memref<16x128xf32, #tpu.memory_space<vmem>>, vector<16x128xf32>
    tpu.vector_store %arg4[%c0_5, %c0_6], %5 {strides = array<i32>} : memref<16x128xf32, #tpu.memory_space<vmem>>, vector<16x128xf32>,
    return
  }
  func.func @transform_0(%arg0: i32) -> (i32, i32) {
    %c0_i32 = arith.constant 0 : i32
    %c0_i32_0 = arith.constant 0 : i32
    return %arg0, %c0_i32 : i32, i32
  }
  func.func @transform_1(%arg0: i32) -> (i32, i32) {
    %c0_i32 = arith.constant 0 : i32
    %c0_i32_0 = arith.constant 0 : i32
    %c0_i32_1 = arith.constant 0 : i32
    return %c0_i32, %c0_i32_0 : i32, i32
  }
  func.func @transform_2(%arg0: i32) -> (i32, i32) {
    %c0_i32 = arith.constant 0 : i32
    %c0_i32_0 = arith.constant 0 : i32
    %c0_i32_1 = arith.constant 0 : i32
    return %c0_i32, %c0_i32_0 : i32, i32
  }
  func.func @transform_3(%arg0: i32) -> (i32, i32) {
    %c0_i32 = arith.constant 0 : i32
    %c0_i32_0 = arith.constant 0 : i32
    return %arg0, %c0_i32 : i32, i32
  }
}

</mosaic_0001>

<bundles_post_ra>
// kernel: tpu_custom_call.1
= control target key start
LH: loop header
LB: loop body
LE: loop exit
PB: predicated region body
PF: predicated region fallthrough
CT: control target
= control target key end

     0   :  { %8 = vsyncpa [#allocation3], 0  ;;  %s297_s0 = inlined_call_operand.hbm [shape: f32[16,32], index: 0, kind: input, shape index: {}]   ;;  %s298_s1 = inlined_call_operand.hbm [shape: f32[32,128], index: 1, kind: input, shape index: {}]   ;;  %s299_s2 = inlined_call_operand.vmem [shape: f32[1,128], index: 2, kind: input, shape index: {}]   ;;  %s300_s3 = inlined_call_operand.hbm [shape: f32[16,128], index: 3, kind: output, shape index: {}]  }
   0x1   :  { %9 = vsyncpa [#allocation6], 0 }
   0x2   :  { %10 = vsyncpa [#allocation4], 0  ;;  %s249_s12 = smov [#allocation2]  }
   0x3   :  { %s16_s13 = sshll.u32 %s249_s12, 4  ;;  %s17_s13 = int_to_ptr.vmem [resolvable:$true] %s16_s13 }
   0x4   :  { %s191_s14 = scalar_lea.vmem %s17_s13, 256  ;;  %p196_p1 = scmp.lt.s32.totalorder %s17_s13, %s17_s13 }
   0x5   :  { %p192_p0 = scmp.ne.s32.totalorder %s17_s13, %s191_s14  ;;  %p197_p2 = scmp.lt.s32.totalorder %s191_s14, %s191_s14 }
   0x7   :  { %p198_p3 = por %p197_p2, %p196_p1 }
   0x9   :  { %p199_p4 = pnand %p198_p3, %p192_p0 }
   0xb   :  { %202 = shalt.err (!%p199_p4)
}
   0xc   :  { %s250_s15 = smov 128   ;;  %s251_s16 = smov 8  }
   0xd   :  { %22 = dma.hbm_to_vmem [thread:$0]  %s297_s0, 256, %s17_s13, [#allocation3], %s250_s15, %s250_s15, %s251_s16  }
   0xe   :  { %s252_s19 = smov [#allocation5]  }
   0xf   :  { %s28_s20 = sshll.u32 %s252_s19, 4  ;;  %s29_s20 = int_to_ptr.vmem [resolvable:$true] %s28_s20 }
  0x10   :  { %s211_s21 = scalar_lea.vmem %s29_s20, 512  ;;  %p216_p6 = scmp.lt.s32.totalorder %s29_s20, %s29_s20 }
  0x11   :  { %p212_p5 = scmp.ne.s32.totalorder %s29_s20, %s211_s21  ;;  %p217_p7 = scmp.lt.s32.totalorder %s211_s21, %s211_s21 }
  0x13   :  { %p218_p8 = por %p217_p7, %p216_p6 }
  0x15   :  { %p219_p9 = pnand %p218_p8, %p212_p5 }
  0x17   :  { %222 = shalt.err (!%p219_p9)
}
  0x18   :  { %34 = dma.hbm_to_vmem [thread:$0]  %s298_s1, 512, %s29_s20, [#allocation6], %s250_s15, %s250_s15, %s251_s16  }
  0x19   :  { %243 = dma.done.wait [#allocation3], 256  }
  0x1a   :  { %244 = vsyncadd [#allocation3], 4294967040 }
  0x1b   :  { %245 = dma.done.wait [#allocation6], 512  }
  0x1c   :  { %246 = vsyncadd [#allocation6], 4294966784  ;;  %vm56_vm0 = vcmask 261120   ;;  %v48_v0 = vld [vmem:[#allocation5 + $0x18] sm:$0xff]  ;;  %v47_v1 = vld [vmem:[#allocation5 + $0x10] sm:$0xff]  ;;  %s253_s24 = smov [#allocation7]  }
  0x1d   :  { %167 = vmatprep.subr.mxu0 %v48_v0  ;;  %v43_v2 = vld [vmem:[#allocation2] sm:$0xff]  ;;  %v46_v3 = vld [vmem:[#allocation5 + $0x8] sm:$0xff]  ;;  %v45_v4 = vld [vmem:[#allocation5] sm:$0xff]  ;;  %s145_s25 = sshll.u32 %s253_s24, 4  ;;  %s146_s25 = int_to_ptr.vmem [resolvable:$true] %s145_s25 }
  0x1e   :  { %168 = vmatpush3.msra.mxu0 %v48_v0  ;;  %175 = vmatprep.mubr.msk.f32.mxu0 %vm56_vm0, %v43_v2  ;;  %v44_v5 = vld [vmem:[#allocation2 + $0x8] sm:$0xff]  ;;  %v158_v6 = vld [vmem:[%s299_s2] ss:$0 sm:$0xff]  ;;  %s223_s26 = scalar_lea.vmem %s146_s25, 256  ;;  %p228_p11 = scmp.lt.s32.totalorder %s146_s25, %s146_s25 }
  0x1f   :  { %169 = vmatprep.subr.mxu0 %v47_v1  ;;  %p224_p10 = scmp.ne.s32.totalorder %s146_s25, %s223_s26  ;;  %p229_p12 = scmp.lt.s32.totalorder %s223_s26, %s223_s26 }
  0x20   :  { %170 = vmatpush3.msra.mxu0 %v47_v1 }
  0x21   :  { %171 = vmatprep.subr.mxu0 %v46_v3  ;;  %p230_p13 = por %p229_p12, %p228_p11 }
  0x22   :  { %172 = vmatpush3.msra.mxu0 %v46_v3 }
  0x23   :  { %173 = vmatprep.subr.mxu0 %v45_v4  ;;  %p231_p0 = pnand %p230_p13, %p224_p10 }
  0x24   :  { %174 = vmatpush3.msra.mxu0 %v45_v4 }
  0x25   :  { %176 = vmatmul.mubr.msk.f32.vlgmr.msra.gmra.mxu0 %vm56_vm0, %v44_v5 }
  0xe5   :  { %v177_v7 = vpop.f32.mrf.mxu0 }
  0xe6   :  { %v135_v8 = vadd.f32 %v177_v7, %v158_v6 }
  0xe7   :  { %v129_v9 = vpop.f32.mrf.mxu0 }
  0xe8   :  { %139 = vst [vmem:[#allocation7 + $0x8] sm:$0xff] %v135_v8  ;;  %v130_v10 = vadd.f32 %v158_v6, %v129_v9 }
  0xea   :  { %138 = vst [vmem:[#allocation7] sm:$0xff] %v130_v10 }
  0xeb   :  { %234 = shalt.err (!%p231_p0)
}
  0xec   :  { %151 = dma.vmem_to_hbm [thread:$0]  %s146_s25, 256, %s300_s3, [#allocation4], %s250_s15, %s250_s15, %s251_s16  }
  0xed   :  { %247 = dma.done.wait [#allocation4], 256  }
  0xee   :  { %248 = vsyncadd [#allocation4], 4294967040 }
  0xef   :  { %155 = vsyncpa [#allocation3], 1 }
  0xf0   :  { %156 = vsyncpa [#allocation6], 1 }
  0xf1   :  { %157 = vsyncpa [#allocation4], 1 }

</bundles_post_ra>
